<compile_context>
chip_gen: v5e
topology: v5e:2x2
jax: 0.10.0
libtpu: 0.0.40
codegen_flags: <defaults>
</compile_context>

<pallas_src>
import jax
import jax.numpy as jnp
from jax.experimental import pallas as pl
from jax.experimental.pallas import tpu as pltpu


def planar_flow_kernel(b_ref, wu_ref, z_ref, fz_ref, ldj_ref):
    # b_ref : (1, 1)  in SMEM (scalar bias)
    # wu_ref: (D, 2)  in VMEM, column 0 = w, column 1 = u
    # z_ref : (D, TB) in VMEM (transposed batch block)
    z = z_ref[...]                     # (D, TB)
    w = wu_ref[:, 0:1]                 # (D, 1)
    u = wu_ref[:, 1:2]                 # (D, 1)
    bias = b_ref[0, 0]                 # scalar

    # F.linear(z, w, b): per-column dot over D (sublane reduce) + bias -> (1, TB)
    lin = jnp.sum(z * w, axis=0, keepdims=True) + bias
    f = jnp.tanh(lin)                  # (1, TB)

    # f_z = z + u * f   ((D,1) x (1,TB) broadcast -> (D, TB))
    fz_ref[...] = z + u * f

    # psi_z @ u.T = (1 - f^2) * (w . u)   (w.u is a per-call scalar)
    wu_dot = jnp.sum(w * u)            # scalar
    dot = (1.0 - f * f) * wu_dot       # (1, TB)
    ldj_ref[...] = jnp.log(jnp.abs(1.0 + dot))


def planar_flow(z, w, b, u, *, block_b=2048):
    """z: (B, D); w: (1, D); b: (1, 1); u: (1, D) -> (f_z (B, D), ldj (B, 1))."""
    B, D = z.shape
    assert block_b % 128 == 0, "batch block must be lane-aligned (multiple of 128)"

    # Lane-aligned batch block; pad B up to a multiple of the block.
    tb = min(block_b, pl.cdiv(B, 128) * 128)
    bpad = pl.cdiv(B, tb) * tb

    # Wrapper-side layout plumbing: transpose to (D, B) and zero-pad lanes.
    zt = jnp.pad(z.T, ((0, 0), (0, bpad - B)))
    wu = jnp.stack([w[0], u[0]], axis=1)            # (D, 2): [w | u]

    grid = (bpad // tb,)
    fz_t, ldj_t = pl.pallas_call(
        planar_flow_kernel,
        grid=grid,
        in_specs=[
            pl.BlockSpec(memory_space=pltpu.MemorySpace.SMEM),      # bias (1,1)
            pl.BlockSpec((D, 2), lambda i: (0, 0)),                 # packed w,u
            pl.BlockSpec((D, tb), lambda i: (0, i)),                # z (D, TB)
        ],
        out_specs=(
            pl.BlockSpec((D, tb), lambda i: (0, i)),                # f_z (D, TB)
            pl.BlockSpec((1, tb), lambda i: (0, i)),                # ldj (1, TB)
        ),
        out_shape=(
            jax.ShapeDtypeStruct((D, bpad), z.dtype),
            jax.ShapeDtypeStruct((1, bpad), z.dtype),
        ),
        compiler_params=pltpu.CompilerParams(
            dimension_semantics=("parallel",)),
    )(b, wu, zt)

    # Back to the module's (B, D) / (B, 1) layout, dropping padding.
    return fz_t[:, :B].T, ldj_t[:, :B].T


def planar_flow_ref(z, w, b, u):
    # Pure-JAX reference mirroring the PyTorch module.
    f = jnp.tanh(z @ w.T + b)
    f_z = z + u * f
    psi_z = (1.0 - f ** 2) * w
    ldj = jnp.log(jnp.abs(1.0 + psi_z @ u.T))
    return f_z, ldj


if __name__ == "__main__":
    latent_size = 10

    key = jax.random.PRNGKey(0)
    k_z, k_w, k_b, k_u, k_z2 = jax.random.split(key, 5)

    # Deterministic parameter init matching nn.Parameter(...).normal_(0, 0.02)
    w = 0.02 * jax.random.normal(k_w, (1, latent_size), dtype=jnp.float32)
    b = 0.02 * jax.random.normal(k_b, (1, 1), dtype=jnp.float32)
    u = 0.02 * jax.random.normal(k_u, (1, latent_size), dtype=jnp.float32)

    # Small, module-consistent test: batch=8, latent=10 (single grid step).
    batch = 8
    z = jax.random.normal(k_z, (batch, latent_size), dtype=jnp.float32)
    f_z, ldj = planar_flow(z, w, b, u)
    jax.block_until_ready((f_z, ldj))

    f_z_ref, ldj_ref = planar_flow_ref(z, w, b, u)
    assert f_z.shape == (batch, latent_size)
    assert ldj.shape == (batch, 1)
    assert jnp.allclose(f_z, f_z_ref, atol=1e-5, rtol=1e-5)
    assert jnp.allclose(ldj, ldj_ref, atol=1e-5, rtol=1e-5)

    # Second check: ragged batch + multi-block grid path (padding discarded).
    batch2 = 300
    z2 = jax.random.normal(k_z2, (batch2, latent_size), dtype=jnp.float32)
    f_z2, ldj2 = planar_flow(z2, w, b, u, block_b=128)
    jax.block_until_ready((f_z2, ldj2))
    f_z2_ref, ldj2_ref = planar_flow_ref(z2, w, b, u)
    assert jnp.allclose(f_z2, f_z2_ref, atol=1e-5, rtol=1e-5)
    assert jnp.allclose(ldj2, ldj2_ref, atol=1e-5, rtol=1e-5)

    print("KERNEL_OK")
</pallas_src>

<mosaic_0001>
module attributes {stable_mosaic.version = 11 : i64} {
  func.func @planar_flow_kernel(%arg0: i32, %arg1: memref<1x1xf32, #tpu.memory_space<smem>>, %arg2: memref<10x2xf32, #tpu.memory_space<vmem>>, %arg3: memref<10x128xf32, #tpu.memory_space<vmem>>, %arg4: memref<10x128xf32, #tpu.memory_space<vmem>>, %arg5: memref<1x128xf32, #tpu.memory_space<vmem>>) attributes {dimension_semantics = [#tpu.dimension_semantics<parallel>], iteration_bounds = array<i64: 1>, scalar_prefetch = 0 : i64, scratch_operands = 0 : i64, tpu.core_type = #tpu.core_type<tc>, window_params = [{transform_indices = @transform_0, window_bounds = array<i64: 1, 1>}, {pipeline_mode = #tpu.pipeline_mode<synchronous>, transform_indices = @transform_1, window_bounds = array<i64: 10, 2>}, {transform_indices = @transform_2, window_bounds = array<i64: 10, 128>}, {transform_indices = @transform_3, window_bounds = array<i64: 10, 128>}, {transform_indices = @transform_4, window_bounds = array<i64: 1, 128>}]} {
    %c0 = arith.constant 0 : index
    %c0_0 = arith.constant 0 : index
    %0 = vector.load %arg3[%c0, %c0_0] : memref<10x128xf32, #tpu.memory_space<vmem>>, vector<10x128xf32>
    %c0_1 = arith.constant 0 : index
    %c0_2 = arith.constant 0 : index
    %1 = vector.load %arg2[%c0_1, %c0_2] : memref<10x2xf32, #tpu.memory_space<vmem>>, vector<10x1xf32>
    %c0_3 = arith.constant 0 : index
    %c1 = arith.constant 1 : index
    %2 = vector.load %arg2[%c0_3, %c1] : memref<10x2xf32, #tpu.memory_space<vmem>>, vector<10x1xf32>
    %c0_4 = arith.constant 0 : index
    %c0_5 = arith.constant 0 : index
    %3 = memref.load %arg1[%c0_4, %c0_5] : memref<1x1xf32, #tpu.memory_space<smem>>
    %4 = vector.broadcast %1 : vector<10x1xf32> to vector<10x128xf32>
    %5 = arith.mulf %0, %4 : vector<10x128xf32>
    %cst = arith.constant dense<0.000000e+00> : vector<128xf32>
    %6 = vector.multi_reduction <add>, %5, %cst [0] : vector<10x128xf32> to vector<128xf32>
    %7 = vector.shape_cast %6 : vector<128xf32> to vector<1x128xf32>
    %8 = vector.broadcast %3 : f32 to vector<1x128xf32>
    %9 = arith.addf %7, %8 : vector<1x128xf32>
    %10 = math.tanh %9 : vector<1x128xf32>
    %11 = vector.broadcast %2 : vector<10x1xf32> to vector<10x128xf32>
    %12 = vector.broadcast %10 : vector<1x128xf32> to vector<10x128xf32>
    %13 = arith.mulf %11, %12 : vector<10x128xf32>
    %14 = arith.addf %0, %13 : vector<10x128xf32>
    %c0_6 = arith.constant 0 : index
    %c0_7 = arith.constant 0 : index
    %15 = vector.load %arg4[%c0_6, %c0_7] : memref<10x128xf32, #tpu.memory_space<vmem>>, vector<10x128xf32>
    tpu.vector_store %arg4[%c0_6, %c0_7], %14 {strides = array<i32>} : memref<10x128xf32, #tpu.memory_space<vmem>>, vector<10x128xf32>,
    %16 = arith.mulf %1, %2 : vector<10x1xf32>
    %17 = vector.shape_cast %16 : vector<10x1xf32> to vector<1x10x1xf32>
    %cst_8 = arith.constant dense<0.000000e+00> : vector<1xf32>
    %18 = vector.multi_reduction <add>, %17, %cst_8 [1, 2] : vector<1x10x1xf32> to vector<1xf32>
    %19 = vector.shape_cast %18 : vector<1xf32> to vector<1x1x1xf32>
    %20 = vector.extract %19[0, 0, 0] : f32 from vector<1x1x1xf32>
    %21 = arith.mulf %10, %10 : vector<1x128xf32>
    %cst_9 = arith.constant 1.000000e+00 : f32
    %22 = vector.broadcast %cst_9 : f32 to vector<1x128xf32>
    %23 = arith.subf %22, %21 : vector<1x128xf32>
    %24 = vector.broadcast %20 : f32 to vector<1x128xf32>
    %25 = arith.mulf %23, %24 : vector<1x128xf32>
    %cst_10 = arith.constant 1.000000e+00 : f32
    %26 = vector.broadcast %cst_10 : f32 to vector<1x128xf32>
    %27 = arith.addf %26, %25 : vector<1x128xf32>
    %28 = math.absf %27 : vector<1x128xf32>
    %29 = math.log %28 : vector<1x128xf32>
    %c0_11 = arith.constant 0 : index
    %c0_12 = arith.constant 0 : index
    %30 = vector.load %arg5[%c0_11, %c0_12] : memref<1x128xf32, #tpu.memory_space<vmem>>, vector<1x128xf32>
    tpu.vector_store %arg5[%c0_11, %c0_12], %29 {strides = array<i32>} : memref<1x128xf32, #tpu.memory_space<vmem>>, vector<1x128xf32>,
    return
  }
  func.func @transform_0(%arg0: i32) -> (i32, i32) {
    %c0_i32 = arith.constant 0 : i32
    %c0_i32_0 = arith.constant 0 : i32
    %c0_i32_1 = arith.constant 0 : i32
    return %c0_i32, %c0_i32_0 : i32, i32
  }
  func.func @transform_1(%arg0: i32) -> (i32, i32) {
    %c0_i32 = arith.constant 0 : i32
    %c0_i32_0 = arith.constant 0 : i32
    %c0_i32_1 = arith.constant 0 : i32
    return %c0_i32, %c0_i32_0 : i32, i32
  }
  func.func @transform_2(%arg0: i32) -> (i32, i32) {
    %c0_i32 = arith.constant 0 : i32
    %c0_i32_0 = arith.constant 0 : i32
    return %c0_i32, %arg0 : i32, i32
  }
  func.func @transform_3(%arg0: i32) -> (i32, i32) {
    %c0_i32 = arith.constant 0 : i32
    %c0_i32_0 = arith.constant 0 : i32
    return %c0_i32, %arg0 : i32, i32
  }
  func.func @transform_4(%arg0: i32) -> (i32, i32) {
    %c0_i32 = arith.constant 0 : i32
    %c0_i32_0 = arith.constant 0 : i32
    return %c0_i32, %arg0 : i32, i32
  }
}

</mosaic_0001>

<bundles_post_ra>
// kernel: tpu_custom_call.1
= control target key start
LH: loop header
LB: loop body
LE: loop exit
PB: predicated region body
PF: predicated region fallthrough
CT: control target
= control target key end

     0   :  { %11 = vsyncpa [#allocation4], 0  ;;  %s249_s0 = inlined_call_operand.<no memory space> [shape: f32[1,1], index: 0, kind: input, shape index: {}]   ;;  %s250_s1 = inlined_call_operand.vmem [shape: f32[10,2], index: 1, kind: input, shape index: {}]   ;;  %s251_s2 = inlined_call_operand.vmem [shape: f32[10,128], index: 2, kind: input, shape index: {}]   ;;  %s252_s3 = inlined_call_operand.hbm [shape: f32[10,128], index: 3, kind: output, shape index: {0}]   ;;  %s253_s4 = inlined_call_operand.hbm [shape: f32[1,128], index: 4, kind: output, shape index: {1}]  }
   0x1   :  { %v21_v0 = vld [vmem:[%s250_s1] sm:$0xff] }
   0x2   :  { %12 = vsyncpa [#allocation6], 0  ;;  %s196_s17 = smov 127   ;;  %v22_v1 = vld [vmem:[%s250_s1 + $0x8] sm:$0x3]  ;;  %v197_v2 = vmov 0   ;;  %v45_v31 = vstv %s249_s0 }
   0x3   :  { %62 = vrot.lane.b32.xlu0 %v21_v0, %s196_s17  ;;  %136 = vset.pattern.permute.xlu1 %v197_v2  ;;  %vm70_vm0 = vcmask 7168   ;;  %vm72_vm1 = vcmask 1024   ;;  %v198_v6 = vmov 1   ;;  %v19_v19 = vld [vmem:[%s251_s2] sm:$0xff]  ;;  %v20_v20 = vld [vmem:[%s251_s2 + $0x8] sm:$0x3] }
   0x4   :  { %137 = vset.pattern.permute.xlu2 %v197_v2  ;;  %139 = vset.pattern.permute.xlu0 %v198_v6  ;;  %vm36_vm2 = vcmask 1041408   ;;  %s199_s2 = smov [#allocation3]   ;;  %s99_s28 = sshll.u32 %s252_s3, 4  ;;  %s100_s28 = int_to_ptr.hbm [resolvable:$true] %s99_s28 }
   0x5   :  { %26 = vperm.xlu2 %137, %v21_v0   ;;  %s97_s25 = sshll.u32 %s199_s2, 4  ;;  %s200_s0 = smov 128   ;;  %s98_s25 = int_to_ptr.vmem [resolvable:$true] %s97_s25 }
   0x6   :  { %s201_s29 = smov 8   ;;  %s202_s3 = smov [#allocation5]  }
   0x7   :  { %s111_s5 = sshll.u32 %s202_s3, 4  ;;  %s113_s8 = sshll.u32 %s253_s4, 4  ;;  %s112_s5 = int_to_ptr.vmem [resolvable:$true] %s111_s5  ;;  %s114_s8 = int_to_ptr.hbm [resolvable:$true] %s113_s8 }
   0xb   :  { %64 = vrot.lane.b32.xlu0 %v22_v1, %s196_s17 }
   0xd   :  { %138 = vset.pattern.permute.xlu2 %v198_v6 }
   0xe   :  { %49 = vperm.xlu2 %138, %v21_v0  }
  0x13   :  { %53 = vperm.xlu0 %139, %v22_v1  }
  0x5f   :  { %v27_v18 = vpop.permute.xlu2 %26 }
  0x60   :  { %v34_v22 = vmul.f32 %v27_v18, %v19_v19 }
  0x68   :  { %v50_v34 = vpop.permute.xlu2 %49 }
  0x75   :  { %v63_v3 = vpop.permute.xlu0 %62 }
  0x76   :  { %v68_v4 = vmul.f32 %v63_v3, %v21_v0 }
  0x78   :  { %v71_v8 = vsel %vm70_vm0, %v68_v4, 0.0 }
  0x7d   :  { %v65_v5 = vpop.permute.xlu0 %64 }
  0x7e   :  { %v69_v7 = vmul.f32 %v65_v5, %v22_v1 }
  0x80   :  { %v73_v9 = vsel %vm72_vm1, %v69_v7, 0.0 }
  0x81   :  { %v74_v10 = vadd.f32 %v73_v9, %v71_v8 }
  0x83   :  { %75 = vadd.xlane.f32.xlu1 %v74_v10 }
  0x85   :  { %v54_v35 = vpop.permute.xlu0 %53 }
  0x9c   :  { %31 = vperm.xlu1 %136, %v22_v1  }
  0xf6   :  { %v76_v11 = vpop.xlane.xlu1 %75 }
  0xf7   :  { %v77_v12 = vrot.slane %v76_v11, 4 }
  0xf9   :  { %v78_v13 = vadd.f32 %v77_v12, %v76_v11 }
  0xfb   :  { %v79_v14 = vrot.slane %v78_v13, 2 }
  0xfd   :  { %v80_v15 = vadd.f32 %v79_v14, %v78_v13 }
  0xff   :  { %v81_v16 = vrot.slane %v80_v15, 1 }
 0x101   :  { %v82_v17 = vadd.f32 %v81_v16, %v80_v15 }
 0x103   :  { %127 = vpush %v82_v17 }
 0x10e   :  { %v32_v21 = vpop.permute.xlu1 %31 }
 0x10f   :  { %v35_v23 = vmul.f32 %v32_v21, %v20_v20 }
 0x111   :  { %v37_v24 = vsel %vm36_vm2, %v35_v23, 0.0 }
 0x112   :  { %v38_v25 = vadd.f32 %v37_v24, %v34_v22 }
 0x114   :  { %v39_v26 = vrot.slane %v38_v25, 4 }
 0x116   :  { %v40_v27 = vadd.f32 %v39_v26, %v38_v25 }
 0x118   :  { %v41_v28 = vrot.slane %v40_v27, 2 }
 0x11a   :  { %v42_v29 = vadd.f32 %v41_v28, %v40_v27 }
 0x11c   :  { %v43_v30 = vrot.slane %v42_v29, 1 }
 0x11e   :  { %v44_v32 = vadd.f32 %v43_v30, %v42_v29 }
 0x120   :  { %v46_v33 = vadd.f32 %v45_v31, %v44_v32 }
 0x122   :  { %140 = vtanh.f32 %v46_v33 }
 0x128   :  { %v141_v36 = vpop.eup %140 }
 0x129   :  { %v56_v37 = vmul.f32 %v141_v36, %v50_v34  ;;  %v57_v38 = vmul.f32 %v141_v36, %v54_v35  ;;  %v84_v41 = vmul.f32 %v141_v36, %v141_v36 }
 0x12b   :  { %v58_v39 = vadd.f32 %v56_v37, %v19_v19  ;;  %v59_v40 = vadd.f32 %v57_v38, %v20_v20  ;;  %v85_v42 = vsub.f32 1.0, %v84_v41 }
 0x12d   :  { %60 = vst [vmem:[#allocation3] sm:$0xff] %v58_v39 }
 0x12e   :  { %61 = vst [vmem:[#allocation3 + $0x8] sm:$0x3] %v59_v40 }
 0x12f   :  { %105 = dma.vmem_to_hbm [thread:$0]  %s98_s25, 256, %s100_s28, [#allocation4], %s200_s0, %s200_s0, %s201_s29  }
 0x134   :  { %s128_s30 = spop %127 }
 0x135   :  { %v86_v43 = vstv %s128_s30 }
 0x136   :  { %v87_v44 = vmul.f32 %v86_v43, %v85_v42 }
 0x138   :  { %v88_v45 = vadd.f32 1.0, %v87_v44 }
 0x13a   :  { %v89_v46 = vand.u32 2147483647, %v88_v45 }
 0x13c   :  { %142 = vlog2.f32 %v89_v46 }
 0x142   :  { %v143_v47 = vpop.eup %142 }
 0x143   :  { %v91_v48 = vmul.f32 0.6931472, %v143_v47 }
 0x145   :  { %92 = vst [vmem:[#allocation5] sm:$0x1] %v91_v48 }
 0x146   :  { %116 = dma.vmem_to_hbm [thread:$0]  %s112_s5, 16, %s114_s8, [#allocation6]  }
 0x147   :  { %192 = dma.done.wait [#allocation4], 256  }
 0x148   :  { %193 = vsyncadd [#allocation4], 4294967040 }
 0x149   :  { %194 = dma.done.wait [#allocation6], 16  }
 0x14a   :  { %195 = vsyncadd [#allocation6], 4294967280 }
 0x14b   :  { %125 = vsyncpa [#allocation4], 1 }
 0x14c   :  { %126 = vsyncpa [#allocation6], 1 }

</bundles_post_ra>
